<compile_context>
chip_gen: v7x
topology: tpu7x:2x2x1
jax: 0.10.0
libtpu: 0.0.40
codegen_flags: <defaults>
</compile_context>

<pallas_src>
import functools

import jax
import jax.numpy as jnp
from jax.experimental import pallas as pl
from jax.experimental.pallas import tpu as pltpu

IN_FEATURES = 1024
NUM_CLASSES = 10
PAD_N = 128          # lane-dense width for the narrow (64 / 10 wide) layers
NEG_INF = -1e30


def _round_up(n, m):
    return ((n + m - 1) // m) * m


def fcnet_kernel(x_ref,
                 w1_ref, b1_ref,
                 w2_ref, b2_ref,
                 w3_ref, b3_ref,
                 w4_ref, b4_ref,
                 o_ref):
    # One batch tile per grid step; weights/biases are resident in VMEM.
    # x arrives f32; cast to bf16 here (VPU work, hidden under the layer-1 matmul).
    x = x_ref[...].astype(jnp.bfloat16)                               # (bt, 1024)

    h = jnp.dot(x, w1_ref[...], preferred_element_type=jnp.float32) + b1_ref[...]
    h = jnp.maximum(h, 0.0)                                           # f32 elementwise

    h = jnp.dot(h.astype(jnp.bfloat16), w2_ref[...],
                preferred_element_type=jnp.float32) + b2_ref[...]
    h = jnp.maximum(h, 0.0)

    h = jnp.dot(h.astype(jnp.bfloat16), w3_ref[...],
                preferred_element_type=jnp.float32) + b3_ref[...]
    h = jnp.maximum(h, 0.0)

    h = jnp.dot(h.astype(jnp.bfloat16), w4_ref[...],
                preferred_element_type=jnp.float32) + b4_ref[...]
    h = jnp.maximum(h, 0.0)                                           # (bt, 128); cols >= 10 are padding

    # Softmax over the 10 real classes (dim=1).  Padded lanes get a huge negative
    # logit so they carry zero probability, while the store stays 128-lane dense.
    col = jax.lax.broadcasted_iota(jnp.int32, h.shape, 1)
    logits = jnp.where(col < NUM_CLASSES, h, NEG_INF)
    m = jnp.max(logits, axis=1, keepdims=True)
    e = jnp.exp(logits - m)
    denom = jnp.sum(e, axis=1, keepdims=True)
    # Exact division: rows sum to 1 to f32 precision (approx reciprocal does not).
    o_ref[...] = (e / denom).astype(o_ref.dtype)


def prepare_params(params):
    """One-time parameter prep (hoisted out of the per-call path):
    zero-pad the narrow layers to 128 lanes and cast weights to bf16 (biases f32).
    Zero weights + zero bias -> zero padded activations; mathematically a no-op."""
    (w1, b1), (w2, b2), (w3, b3), (w4, b4) = params
    w3p = jnp.pad(w3, ((0, 0), (0, PAD_N - w3.shape[1])))                       # (128, 128)
    b3p = jnp.pad(b3, ((0, 0), (0, PAD_N - b3.shape[1])))                       # (1, 128)
    w4p = jnp.pad(w4, ((0, PAD_N - w4.shape[0]), (0, PAD_N - w4.shape[1])))     # (128, 128)
    b4p = jnp.pad(b4, ((0, 0), (0, PAD_N - b4.shape[1])))                       # (1, 128)
    return (w1.astype(jnp.bfloat16), b1,
            w2.astype(jnp.bfloat16), b2,
            w3p.astype(jnp.bfloat16), b3p,
            w4p.astype(jnp.bfloat16), b4p)


@functools.partial(jax.jit, static_argnames=("block_b",))
def fcnet_forward(x, prepped, *, block_b=512):
    w1b, b1, w2b, b2, w3b, b3, w4b, b4 = prepped
    B = x.shape[0]

    # Batch tile selection:
    #   * large batches: full block_b tiles (amortize ~0.35 us/step overhead),
    #   * mid-size batches: split into >= 2 grid steps (both v7x TensorCores),
    #   * small batches: single tile rounded to 16 rows (bf16 sublane packing).
    if B > block_b:
        bt = block_b
    elif B >= 512:
        bt = _round_up(-(-B // 2), 16)
    else:
        bt = _round_up(B, 16)
    Bp = _round_up(B, bt)
    xp = x if Bp == B else jnp.pad(x, ((0, Bp - B), (0, 0)))
    grid = (Bp // bt,)

    def resident(shape):   # same block every grid step -> DMA'd once, stays in VMEM
        return pl.BlockSpec(shape, lambda i: tuple(0 for _ in shape))

    flops = 2 * Bp * (IN_FEATURES * 256 + 256 * 128 + 128 * PAD_N + PAD_N * PAD_N)
    bytes_accessed = (xp.size * 4 + Bp * PAD_N * 4
                      + sum(w.size * 2 for w in (w1b, w2b, w3b, w4b))
                      + sum(b.size * 4 for b in (b1, b2, b3, b4)))
    cost = pl.CostEstimate(flops=flops,
                           transcendentals=Bp * PAD_N,
                           bytes_accessed=bytes_accessed)

    compiler_kwargs = dict(dimension_semantics=("parallel",))
    if bt >= 1024:   # v5e scoped-VMEM default is 16 MiB; big tiles need more.
        compiler_kwargs["vmem_limit_bytes"] = 64 * 1024 * 1024

    out = pl.pallas_call(
        fcnet_kernel,
        out_shape=jax.ShapeDtypeStruct((Bp, PAD_N), jnp.float32),
        grid=grid,
        in_specs=[
            pl.BlockSpec((bt, IN_FEATURES), lambda i: (i, 0)),
            resident(w1b.shape), resident(b1.shape),
            resident(w2b.shape), resident(b2.shape),
            resident(w3b.shape), resident(b3.shape),
            resident(w4b.shape), resident(b4.shape),
        ],
        out_specs=pl.BlockSpec((bt, PAD_N), lambda i: (i, 0)),
        compiler_params=pltpu.CompilerParams(**compiler_kwargs),
        cost_estimate=cost,
    )(xp, w1b, b1, w2b, b2, w3b, b3, w4b, b4)

    # Fused with the call under jit; drops padded batch rows and padded class lanes.
    return out[:B, :NUM_CLASSES]


def init_params(key):
    """Deterministic params: Linear layers as (in, out) weights + (1, out) biases."""
    dims = [IN_FEATURES, 256, 128, 64, NUM_CLASSES]
    params = []
    for fan_in, fan_out in zip(dims[:-1], dims[1:]):
        kw, kb, key = jax.random.split(key, 3)
        bound = 1.0 / jnp.sqrt(fan_in)  # matches PyTorch nn.Linear init range
        w = jax.random.uniform(kw, (fan_in, fan_out), jnp.float32, -bound, bound)
        b = jax.random.uniform(kb, (1, fan_out), jnp.float32, -bound, bound)
        params.append((w, b))
    return params


def reference_forward(x, params):
    """Pure-JAX reference mirroring the kernel's bf16-in / f32-accumulate numerics."""
    h = x.astype(jnp.bfloat16)
    a = None
    for w, b in params:
        a = jnp.dot(h, w.astype(jnp.bfloat16),
                    preferred_element_type=jnp.float32) + b
        a = jnp.maximum(a, 0.0)
        h = a.astype(jnp.bfloat16)
    return jax.nn.softmax(a, axis=1)


if __name__ == "__main__":
    key = jax.random.PRNGKey(0)
    kx, kp = jax.random.split(key)
    params = init_params(kp)
    prepped = prepare_params(params)   # one-time weight prep, reused across calls

    # Small-batch check (single grid step, 16-row tile, batch padding path).
    B = 8
    x = jax.random.normal(kx, (B, IN_FEATURES), dtype=jnp.float32)
    out = jax.block_until_ready(fcnet_forward(x, prepped))
    ref = reference_forward(x, params)
    assert out.shape == (B, NUM_CLASSES)
    assert jnp.allclose(out, ref, atol=2e-3), "mismatch vs JAX reference (B=8)"
    assert jnp.allclose(jnp.sum(out, axis=1), jnp.ones((B,)), atol=2e-3)

    # Multi-tile check: exercises the batch grid + ragged-batch padding path.
    B2 = 160
    x2 = jax.random.normal(jax.random.PRNGKey(1), (B2, IN_FEATURES), dtype=jnp.float32)
    out2 = jax.block_until_ready(fcnet_forward(x2, prepped, block_b=64))
    ref2 = reference_forward(x2, params)
    assert out2.shape == (B2, NUM_CLASSES)
    assert jnp.allclose(out2, ref2, atol=2e-3), "mismatch vs JAX reference (B=160)"
    assert jnp.allclose(jnp.sum(out2, axis=1), jnp.ones((B2,)), atol=2e-3)

    print("KERNEL_OK")
</pallas_src>

<mosaic_0001>
module attributes {stable_mosaic.version = 11 : i64} {
  func.func @fcnet_kernel(%arg0: i32, %arg1: memref<16x1024xf32, #tpu.memory_space<vmem>>, %arg2: memref<1024x256xbf16, #tpu.memory_space<vmem>>, %arg3: memref<1x256xf32, #tpu.memory_space<vmem>>, %arg4: memref<256x128xbf16, #tpu.memory_space<vmem>>, %arg5: memref<1x128xf32, #tpu.memory_space<vmem>>, %arg6: memref<128x128xbf16, #tpu.memory_space<vmem>>, %arg7: memref<1x128xf32, #tpu.memory_space<vmem>>, %arg8: memref<128x128xbf16, #tpu.memory_space<vmem>>, %arg9: memref<1x128xf32, #tpu.memory_space<vmem>>, %arg10: memref<16x128xf32, #tpu.memory_space<vmem>>) attributes {dimension_semantics = [#tpu.dimension_semantics<parallel>], iteration_bounds = array<i64: 1>, scalar_prefetch = 0 : i64, scratch_operands = 0 : i64, tpu.core_type = #tpu.core_type<tc>, window_params = [{transform_indices = @transform_0, window_bounds = array<i64: 16, 1024>}, {pipeline_mode = #tpu.pipeline_mode<synchronous>, transform_indices = @transform_1, window_bounds = array<i64: 1024, 256>}, {pipeline_mode = #tpu.pipeline_mode<synchronous>, transform_indices = @transform_2, window_bounds = array<i64: 1, 256>}, {pipeline_mode = #tpu.pipeline_mode<synchronous>, transform_indices = @transform_3, window_bounds = array<i64: 256, 128>}, {pipeline_mode = #tpu.pipeline_mode<synchronous>, transform_indices = @transform_4, window_bounds = array<i64: 1, 128>}, {pipeline_mode = #tpu.pipeline_mode<synchronous>, transform_indices = @transform_5, window_bounds = array<i64: 128, 128>}, {pipeline_mode = #tpu.pipeline_mode<synchronous>, transform_indices = @transform_6, window_bounds = array<i64: 1, 128>}, {pipeline_mode = #tpu.pipeline_mode<synchronous>, transform_indices = @transform_7, window_bounds = array<i64: 128, 128>}, {pipeline_mode = #tpu.pipeline_mode<synchronous>, transform_indices = @transform_8, window_bounds = array<i64: 1, 128>}, {transform_indices = @transform_9, window_bounds = array<i64: 16, 128>}]} {
    %c0 = arith.constant 0 : index
    %c0_0 = arith.constant 0 : index
    %0 = vector.load %arg1[%c0, %c0_0] : memref<16x1024xf32, #tpu.memory_space<vmem>>, vector<16x1024xf32>
    %1 = arith.truncf %0 : vector<16x1024xf32> to vector<16x1024xbf16>
    %c0_1 = arith.constant 0 : index
    %c0_2 = arith.constant 0 : index
    %2 = vector.load %arg2[%c0_1, %c0_2] : memref<1024x256xbf16, #tpu.memory_space<vmem>>, vector<1024x256xbf16>
    %cst = arith.constant dense<0.000000e+00> : vector<16x256xf32>
    %3 = tpu.matmul %1, %2, %cst {dimension_numbers = #tpu.dot_dimension_numbers<[1], [0], [0], [1], [0, 0, 1, 1], [], []>} : vector<16x1024xbf16>, vector<1024x256xbf16>, vector<16x256xf32> -> vector<16x256xf32>
    %c0_3 = arith.constant 0 : index
    %c0_4 = arith.constant 0 : index
    %4 = vector.load %arg3[%c0_3, %c0_4] : memref<1x256xf32, #tpu.memory_space<vmem>>, vector<1x256xf32>
    %5 = vector.broadcast %4 : vector<1x256xf32> to vector<16x256xf32>
    %6 = arith.addf %3, %5 : vector<16x256xf32>
    %cst_5 = arith.constant 0.000000e+00 : f32
    %7 = vector.broadcast %cst_5 : f32 to vector<16x256xf32>
    %8 = arith.maximumf %6, %7 : vector<16x256xf32>
    %9 = arith.truncf %8 : vector<16x256xf32> to vector<16x256xbf16>
    %c0_6 = arith.constant 0 : index
    %c0_7 = arith.constant 0 : index
    %10 = vector.load %arg4[%c0_6, %c0_7] : memref<256x128xbf16, #tpu.memory_space<vmem>>, vector<256x128xbf16>
    %cst_8 = arith.constant dense<0.000000e+00> : vector<16x128xf32>
    %11 = tpu.matmul %9, %10, %cst_8 {dimension_numbers = #tpu.dot_dimension_numbers<[1], [0], [0], [1], [0, 0, 1, 1], [], []>} : vector<16x256xbf16>, vector<256x128xbf16>, vector<16x128xf32> -> vector<16x128xf32>
    %c0_9 = arith.constant 0 : index
    %c0_10 = arith.constant 0 : index
    %12 = vector.load %arg5[%c0_9, %c0_10] : memref<1x128xf32, #tpu.memory_space<vmem>>, vector<1x128xf32>
    %13 = vector.broadcast %12 : vector<1x128xf32> to vector<16x128xf32>
    %14 = arith.addf %11, %13 : vector<16x128xf32>
    %cst_11 = arith.constant 0.000000e+00 : f32
    %15 = vector.broadcast %cst_11 : f32 to vector<16x128xf32>
    %16 = arith.maximumf %14, %15 : vector<16x128xf32>
    %17 = arith.truncf %16 : vector<16x128xf32> to vector<16x128xbf16>
    %c0_12 = arith.constant 0 : index
    %c0_13 = arith.constant 0 : index
    %18 = vector.load %arg6[%c0_12, %c0_13] : memref<128x128xbf16, #tpu.memory_space<vmem>>, vector<128x128xbf16>
    %cst_14 = arith.constant dense<0.000000e+00> : vector<16x128xf32>
    %19 = tpu.matmul %17, %18, %cst_14 {dimension_numbers = #tpu.dot_dimension_numbers<[1], [0], [0], [1], [0, 0, 1, 1], [], []>} : vector<16x128xbf16>, vector<128x128xbf16>, vector<16x128xf32> -> vector<16x128xf32>
    %c0_15 = arith.constant 0 : index
    %c0_16 = arith.constant 0 : index
    %20 = vector.load %arg7[%c0_15, %c0_16] : memref<1x128xf32, #tpu.memory_space<vmem>>, vector<1x128xf32>
    %21 = vector.broadcast %20 : vector<1x128xf32> to vector<16x128xf32>
    %22 = arith.addf %19, %21 : vector<16x128xf32>
    %cst_17 = arith.constant 0.000000e+00 : f32
    %23 = vector.broadcast %cst_17 : f32 to vector<16x128xf32>
    %24 = arith.maximumf %22, %23 : vector<16x128xf32>
    %25 = arith.truncf %24 : vector<16x128xf32> to vector<16x128xbf16>
    %c0_18 = arith.constant 0 : index
    %c0_19 = arith.constant 0 : index
    %26 = vector.load %arg8[%c0_18, %c0_19] : memref<128x128xbf16, #tpu.memory_space<vmem>>, vector<128x128xbf16>
    %cst_20 = arith.constant dense<0.000000e+00> : vector<16x128xf32>
    %27 = tpu.matmul %25, %26, %cst_20 {dimension_numbers = #tpu.dot_dimension_numbers<[1], [0], [0], [1], [0, 0, 1, 1], [], []>} : vector<16x128xbf16>, vector<128x128xbf16>, vector<16x128xf32> -> vector<16x128xf32>
    %c0_21 = arith.constant 0 : index
    %c0_22 = arith.constant 0 : index
    %28 = vector.load %arg9[%c0_21, %c0_22] : memref<1x128xf32, #tpu.memory_space<vmem>>, vector<1x128xf32>
    %29 = vector.broadcast %28 : vector<1x128xf32> to vector<16x128xf32>
    %30 = arith.addf %27, %29 : vector<16x128xf32>
    %cst_23 = arith.constant 0.000000e+00 : f32
    %31 = vector.broadcast %cst_23 : f32 to vector<16x128xf32>
    %32 = arith.maximumf %30, %31 : vector<16x128xf32>
    %33 = tpu.iota {dimensions = array<i32: 1>} : vector<16x128xi32>
    %c10_i32 = arith.constant 10 : i32
    %34 = vector.broadcast %c10_i32 : i32 to vector<16x128xi32>
    %35 = arith.cmpi slt, %33, %34 : vector<16x128xi32>
    %cst_24 = arith.constant -1.000000e+30 : f32
    %36 = vector.broadcast %cst_24 : f32 to vector<16x128xf32>
    %37 = arith.select %35, %32, %36 : vector<16x128xi1>, vector<16x128xf32>
    %cst_25 = arith.constant dense<0xFF800000> : vector<16xf32>
    %38 = vector.multi_reduction <maximumf>, %37, %cst_25 [1] : vector<16x128xf32> to vector<16xf32>
    %39 = vector.shape_cast %38 : vector<16xf32> to vector<16x1xf32>
    %40 = vector.broadcast %39 : vector<16x1xf32> to vector<16x128xf32>
    %41 = arith.subf %37, %40 : vector<16x128xf32>
    %42 = math.exp %41 : vector<16x128xf32>
    %cst_26 = arith.constant dense<0.000000e+00> : vector<16xf32>
    %43 = vector.multi_reduction <add>, %42, %cst_26 [1] : vector<16x128xf32> to vector<16xf32>
    %44 = vector.shape_cast %43 : vector<16xf32> to vector<16x1xf32>
    %45 = vector.broadcast %44 : vector<16x1xf32> to vector<16x128xf32>
    %46 = arith.divf %42, %45 : vector<16x128xf32>
    %c0_27 = arith.constant 0 : index
    %c0_28 = arith.constant 0 : index
    %47 = vector.load %arg10[%c0_27, %c0_28] : memref<16x128xf32, #tpu.memory_space<vmem>>, vector<16x128xf32>
    tpu.vector_store %arg10[%c0_27, %c0_28], %46 {strides = array<i32>} : memref<16x128xf32, #tpu.memory_space<vmem>>, vector<16x128xf32>,
    return
  }
  func.func @transform_0(%arg0: i32) -> (i32, i32) {
    %c0_i32 = arith.constant 0 : i32
    %c0_i32_0 = arith.constant 0 : i32
    return %arg0, %c0_i32 : i32, i32
  }
  func.func @transform_1(%arg0: i32) -> (i32, i32) {
    %c0_i32 = arith.constant 0 : i32
    %c0_i32_0 = arith.constant 0 : i32
    %c0_i32_1 = arith.constant 0 : i32
    return %c0_i32, %c0_i32_0 : i32, i32
  }
  func.func @transform_2(%arg0: i32) -> (i32, i32) {
    %c0_i32 = arith.constant 0 : i32
    %c0_i32_0 = arith.constant 0 : i32
    %c0_i32_1 = arith.constant 0 : i32
    return %c0_i32, %c0_i32_0 : i32, i32
  }
  func.func @transform_3(%arg0: i32) -> (i32, i32) {
    %c0_i32 = arith.constant 0 : i32
    %c0_i32_0 = arith.constant 0 : i32
    %c0_i32_1 = arith.constant 0 : i32
    return %c0_i32, %c0_i32_0 : i32, i32
  }
  func.func @transform_4(%arg0: i32) -> (i32, i32) {
    %c0_i32 = arith.constant 0 : i32
    %c0_i32_0 = arith.constant 0 : i32
    %c0_i32_1 = arith.constant 0 : i32
    return %c0_i32, %c0_i32_0 : i32, i32
  }
  func.func @transform_5(%arg0: i32) -> (i32, i32) {
    %c0_i32 = arith.constant 0 : i32
    %c0_i32_0 = arith.constant 0 : i32
    %c0_i32_1 = arith.constant 0 : i32
    return %c0_i32, %c0_i32_0 : i32, i32
  }
  func.func @transform_6(%arg0: i32) -> (i32, i32) {
    %c0_i32 = arith.constant 0 : i32
    %c0_i32_0 = arith.constant 0 : i32
    %c0_i32_1 = arith.constant 0 : i32
    return %c0_i32, %c0_i32_0 : i32, i32
  }
  func.func @transform_7(%arg0: i32) -> (i32, i32) {
    %c0_i32 = arith.constant 0 : i32
    %c0_i32_0 = arith.constant 0 : i32
    %c0_i32_1 = arith.constant 0 : i32
    return %c0_i32, %c0_i32_0 : i32, i32
  }
  func.func @transform_8(%arg0: i32) -> (i32, i32) {
    %c0_i32 = arith.constant 0 : i32
    %c0_i32_0 = arith.constant 0 : i32
    %c0_i32_1 = arith.constant 0 : i32
    return %c0_i32, %c0_i32_0 : i32, i32
  }
  func.func @transform_9(%arg0: i32) -> (i32, i32) {
    %c0_i32 = arith.constant 0 : i32
    %c0_i32_0 = arith.constant 0 : i32
    return %arg0, %c0_i32 : i32, i32
  }
}

</mosaic_0001>

<bundles_post_ra>
// kernel: fcnet_forward.1
= control target key start
LH: loop header
LB: loop body
LE: loop exit
PB: predicated region body
PF: predicated region fallthrough
CT: control target
= control target key end

     0   :  { %14 = vsyncpa [#allocation3], 0  ;;  %s2271_s0 = inlined_call_operand.vmem [shape: f32[16,1024], index: 0, kind: input, shape index: {}]   ;;  %s2272_s1 = inlined_call_operand.hbm [shape: bf16[1024,256], index: 1, kind: input, shape index: {}]   ;;  %s2273_s2 = inlined_call_operand.vmem [shape: f32[1,256], index: 2, kind: input, shape index: {}]   ;;  %s2274_s3 = inlined_call_operand.vmem [shape: bf16[256,128], index: 3, kind: input, shape index: {}]   ;;  %s2275_s4 = inlined_call_operand.vmem [shape: f32[1,128], index: 4, kind: input, shape index: {}]   ;;  %s2276_s5 = inlined_call_operand.vmem [shape: bf16[128,128], index: 5, kind: input, shape index: {}]   ;;  %s2277_s6 = inlined_call_operand.vmem [shape: f32[1,128], index: 6, kind: input, shape index: {}]   ;;  %s2278_s7 = inlined_call_operand.hbm [shape: bf16[128,128], index: 7, kind: input, shape index: {}]   ;;  %s2279_s8 = inlined_call_operand.vmem [shape: f32[1,128], index: 8, kind: input, shape index: {}]   ;;  %s2280_s9 = inlined_call_operand.vmem [shape: f32[16,128], index: 9, kind: output, shape index: {}]  }
   0x1   :  { %15 = vsyncpa [#allocation5], 0  ;;  %s2029_s30 = smov [#allocation2]   ;;  %s1981_s13 = scalar_lea.hbm %s2272_s1, 16384 }
   0x2   :  { %s23_s10 = sshll.u32 %s2029_s30, 4  ;;  %p1982_p0 = scmp.ne.s32.totalorder %s2272_s1, %s1981_s13  ;;  %s24_s10 = int_to_ptr.vmem [resolvable:$true] %s23_s10 }
   0x3   :  { %p1985_p1 = scmp.lt.u32.totalorder %s1981_s13, %s2272_s1 }
   0x5   :  { %p1987_p2 = pnand %p1985_p1, %p1982_p0 }
   0x7   :  { %1990 = shalt.err (!%p1987_p2)
}
   0x8   :  { %s1991_s18 = scalar_lea.vmem %s24_s10, 16384  ;;  %p1996_p4 = scmp.lt.s32.totalorder %s24_s10, %s24_s10 }
   0x9   :  { %p1992_p3 = scmp.ne.s32.totalorder %s24_s10, %s1991_s18  ;;  %p1997_p5 = scmp.lt.s32.totalorder %s1991_s18, %s1991_s18 }
   0xb   :  { %p1998_p6 = por %p1997_p5, %p1996_p4 }
   0xd   :  { %p1999_p7 = pnand %p1998_p6, %p1992_p3 }
   0xf   :  { %2002 = shalt.err (!%p1999_p7)
}
  0x10   :  { %s2030_s19 = smov 128   ;;  %s2031_s20 = smov 8  }
  0x11   :  { %29 = dma.hbm_to_vmem [thread:$0]  %s2272_s1, 16384, %s24_s10, [#allocation3], %s2030_s19, %s2030_s19, %s2031_s20  }
  0x12   :  { %s2032_s23 = smov [#allocation4]   ;;  %s2003_s27 = scalar_lea.hbm %s2278_s7, 1024 }
  0x13   :  { %s45_s24 = sshll.u32 %s2032_s23, 4  ;;  %p2004_p8 = scmp.ne.s32.totalorder %s2278_s7, %s2003_s27  ;;  %s46_s24 = int_to_ptr.vmem [resolvable:$true] %s45_s24 }
  0x14   :  { %p2007_p9 = scmp.lt.u32.totalorder %s2003_s27, %s2278_s7 }
  0x16   :  { %p2009_p10 = pnand %p2007_p9, %p2004_p8 }
  0x18   :  { %2012 = shalt.err (!%p2009_p10)
}
  0x19   :  { %s2013_s12 = scalar_lea.vmem %s46_s24, 1024  ;;  %p2018_p12 = scmp.lt.s32.totalorder %s46_s24, %s46_s24 }
  0x1a   :  { %p2014_p11 = scmp.ne.s32.totalorder %s46_s24, %s2013_s12  ;;  %p2019_p13 = scmp.lt.s32.totalorder %s2013_s12, %s2013_s12 }
  0x1c   :  { %p2020_p0 = por %p2019_p13, %p2018_p12 }
  0x1e   :  { %p2021_p1 = pnand %p2020_p0, %p2014_p11 }
  0x20   :  { %2024 = shalt.err (!%p2021_p1)
}
  0x21   :  { %s2033_s1 = smov 64   ;;  %s2034_s10 = smov 4  }
  0x22   :  { %51 = dma.hbm_to_vmem [thread:$0]  %s2278_s7, 1024, %s46_s24, [#allocation5], %s2033_s1, %s2033_s1, %s2034_s10  }
  0x23   :  { %2025 = dma.done.wait [#allocation3], 16384  }
  0x24   :  { %2026 = vsyncadd [#allocation3], 4294950912 }
  0x25   :  { %2027 = dma.done.wait [#allocation5], 1024  }
  0x26   :  { %2028 = vsyncadd [#allocation5], 4294966272  ;;  %v1749_v0 = vld [vmem:[#allocation2 + $0x104] ss:$8 sps:$4 sm:$0xff]   ;;  %v1751_v1 = vld [vmem:[#allocation2 + $0x100] ss:$8 sps:$4 sm:$0xff]  }
  0x27   :  { %908 = vmatprep.subr.bf16.mxu0 %v1749_v0  ;;  %v1752_v2 = vld [vmem:[#allocation2 + $0x114] ss:$8 sps:$4 sm:$0xff]   ;;  %v1754_v3 = vld [vmem:[#allocation2 + $0x110] ss:$8 sps:$4 sm:$0xff]   ;;  %v1755_v4 = vld [vmem:[#allocation2 + $0x124] ss:$8 sps:$4 sm:$0xff]  }
  0x28   :  { %909 = vmatpush1.bf16.msra.mxu0 %v1751_v1  ;;  %v1757_v5 = vld [vmem:[#allocation2 + $0x120] ss:$8 sps:$4 sm:$0xff]   ;;  %v1758_v6 = vld [vmem:[#allocation2 + $0x134] ss:$8 sps:$4 sm:$0xff]   ;;  %v1760_v7 = vld [vmem:[#allocation2 + $0x130] ss:$8 sps:$4 sm:$0xff]  }
  0x29   :  { %910 = vmatprep.subr.bf16.mxu0 %v1752_v2  ;;  %v1761_v8 = vld [vmem:[#allocation2 + $0x144] ss:$8 sps:$4 sm:$0xff]   ;;  %v1763_v9 = vld [vmem:[#allocation2 + $0x140] ss:$8 sps:$4 sm:$0xff]   ;;  %v1764_v10 = vld [vmem:[#allocation2 + $0x154] ss:$8 sps:$4 sm:$0xff]  }
  0x2a   :  { %v1766_v11 = vld [vmem:[#allocation2 + $0x150] ss:$8 sps:$4 sm:$0xff]   ;;  %v1767_v12 = vld [vmem:[#allocation2 + $0x164] ss:$8 sps:$4 sm:$0xff]   ;;  %v1769_v16 = vld [vmem:[#allocation2 + $0x160] ss:$8 sps:$4 sm:$0xff]  }
  0x2b   :  { %v64_v13 = vld [vmem:[%s2271_s0 + $0x18] sm:$0xff]  ;;  %v1773_v19 = vld [vmem:[#allocation2 + $0x184] ss:$8 sps:$4 sm:$0xff]   ;;  %v1775_v20 = vld [vmem:[#allocation2 + $0x180] ss:$8 sps:$4 sm:$0xff]   ;;  %vm2036_vm0 = vmmov 0  }
  0x2c   :  { %911 = vmatpush1.bf16.msra.mxu0 %v1754_v3  ;;  %v72_v14 = vld [vmem:[%s2271_s0 + $0x58] sm:$0xff]  ;;  %v1779_v23 = vld [vmem:[#allocation2 + $0x1a4] ss:$8 sps:$4 sm:$0xff]   ;;  %v1781_v24 = vld [vmem:[#allocation2 + $0x1a0] ss:$8 sps:$4 sm:$0xff]  }
  0x2d   :  { %912 = vmatprep.subr.bf16.mxu0 %v1755_v4  ;;  %v80_v15 = vpack.c.bf16 %v72_v14, %v64_v13  ;;  %v1770_v17 = vld [vmem:[#allocation2 + $0x174] ss:$8 sps:$4 sm:$0xff]   ;;  %v1772_v18 = vld [vmem:[#allocation2 + $0x170] ss:$8 sps:$4 sm:$0xff]   ;;  %v1842_v27 = vld [vmem:[#allocation2 + $0x4] ss:$8 sps:$4 sm:$0xff]  }
  0x2e   :  { %v1776_v21 = vld [vmem:[#allocation2 + $0x194] ss:$8 sps:$4 sm:$0xff]   ;;  %v1778_v22 = vld [vmem:[#allocation2 + $0x190] ss:$8 sps:$4 sm:$0xff]   ;;  %v1844_v28 = vld [vmem:[#allocation2] ss:$8 sps:$4 sm:$0xff]   ;;  %865 = vmatprep.subr.bf16.mxu1 %v1842_v27 }
  0x2f   :  { %940 = vmatprep.mubr.bf16.mxu0 %v80_v15  ;;  %v1782_v25 = vld [vmem:[#allocation2 + $0x1b4] ss:$8 sps:$4 sm:$0xff]   ;;  %v1784_v26 = vld [vmem:[#allocation2 + $0x1b0] ss:$8 sps:$4 sm:$0xff]   ;;  %v1785_v29 = vld [vmem:[#allocation2 + $0x1c4] ss:$8 sps:$4 sm:$0xff]   ;;  %866 = vmatpush1.bf16.msra.mxu1 %v1844_v28 }
  0x30   :  { %913 = vmatpush1.bf16.msra.mxu0 %v1757_v5  ;;  %v1848_v30 = vld [vmem:[#allocation2 + $0x14] ss:$8 sps:$4 sm:$0xff]   ;;  %v1850_v31 = vld [vmem:[#allocation2 + $0x10] ss:$8 sps:$4 sm:$0xff]   ;;  %v1787_v32 = vld [vmem:[#allocation2 + $0x1c0] ss:$8 sps:$4 sm:$0xff]  }
  0x31   :  { %914 = vmatprep.subr.bf16.mxu0 %v1758_v6  ;;  %v1788_v33 = vld [vmem:[#allocation2 + $0x1d4] ss:$8 sps:$4 sm:$0xff]   ;;  %867 = vmatprep.subr.bf16.mxu1 %v1848_v30  ;;  %v1854_v34 = vld [vmem:[#allocation2 + $0x24] ss:$8 sps:$4 sm:$0xff]   ;;  %v1856_v35 = vld [vmem:[#allocation2 + $0x20] ss:$8 sps:$4 sm:$0xff]  }
  0x32   :  { %v1790_v36 = vld [vmem:[#allocation2 + $0x1d0] ss:$8 sps:$4 sm:$0xff]   ;;  %v1791_v37 = vld [vmem:[#allocation2 + $0x1e4] ss:$8 sps:$4 sm:$0xff]   ;;  %v1860_v38 = vld [vmem:[#allocation2 + $0x34] ss:$8 sps:$4 sm:$0xff]  }
  0x33   :  { %868 = vmatpush1.bf16.msra.mxu1 %v1850_v31  ;;  %v1862_v39 = vld [vmem:[#allocation2 + $0x30] ss:$8 sps:$4 sm:$0xff]   ;;  %v1793_v40 = vld [vmem:[#allocation2 + $0x1e0] ss:$8 sps:$4 sm:$0xff]   ;;  %v1866_v41 = vld [vmem:[#allocation2 + $0x44] ss:$8 sps:$4 sm:$0xff]  }
  0x34   :  { %915 = vmatpush1.bf16.msra.mxu0 %v1760_v7  ;;  %869 = vmatprep.subr.bf16.mxu1 %v1854_v34  ;;  %v1794_v42 = vld [vmem:[#allocation2 + $0x1f4] ss:$8 sps:$4 sm:$0xff]   ;;  %v1796_v43 = vld [vmem:[#allocation2 + $0x1f0] ss:$8 sps:$4 sm:$0xff]   ;;  %v1799_v45 = vld [vmem:[#allocation2 + $0x204] ss:$8 sps:$4 sm:$0xff]  }
  0x35   :  { %916 = vmatprep.subr.bf16.mxu0 %v1761_v8  ;;  %v63_v44 = vld [vmem:[%s2271_s0 + $0x10] sm:$0xff]  ;;  %v1868_v47 = vld [vmem:[#allocation2 + $0x40] ss:$8 sps:$4 sm:$0xff]   ;;  %v1878_v56 = vld [vmem:[#allocation2 + $0x64] ss:$8 sps:$4 sm:$0xff]  }
  0x36   :  { %v71_v46 = vld [vmem:[%s2271_s0 + $0x50] sm:$0xff]  ;;  %v66_v48 = vld [vmem:[%s2271_s0 + $0x28] sm:$0xff]  ;;  %v69_v34 = vld [vmem:[%s2271_s0 + $0x40] sm:$0xff] }
  0x37   :  { %870 = vmatpush1.bf16.msra.mxu1 %v1856_v35  ;;  %v1872_v49 = vld [vmem:[#allocation2 + $0x54] ss:$8 sps:$4 sm:$0xff]   ;;  %v74_v50 = vld [vmem:[%s2271_s0 + $0x68] sm:$0xff]  ;;  %v79_v51 = vpack.c.bf16 %v71_v46, %v63_v44  ;;  %v1874_v52 = vld [vmem:[#allocation2 + $0x50] ss:$8 sps:$4 sm:$0xff]  }
  0x38   :  { %917 = vmatpush1.bf16.msra.mxu0 %v1763_v9  ;;  %871 = vmatprep.subr.bf16.mxu1 %v1860_v38  ;;  %v1797_v53 = vld [vmem:[#allocation2 + $0x200] ss:$8 sps:$4 sm:$0xff]   ;;  %v1802_v54 = vld [vmem:[#allocation2 + $0x214] ss:$8 sps:$4 sm:$0xff]   ;;  %v82_v55 = vpack.c.bf16 %v74_v50, %v66_v48  ;;  %v1800_v58 = vld [vmem:[#allocation2 + $0x210] ss:$8 sps:$4 sm:$0xff]  }
  0x39   :  { %918 = vmatprep.subr.bf16.mxu0 %v1764_v10  ;;  %v1880_v57 = vld [vmem:[#allocation2 + $0x60] ss:$8 sps:$4 sm:$0xff]   ;;  %v1884_v59 = vld [vmem:[#allocation2 + $0x74] ss:$8 sps:$4 sm:$0xff]   ;;  %v1805_v60 = vld [vmem:[#allocation2 + $0x224] ss:$8 sps:$4 sm:$0xff]  }
  0x3a   :  { %v1886_v61 = vld [vmem:[#allocation2 + $0x70] ss:$8 sps:$4 sm:$0xff]   ;;  %v1803_v62 = vld [vmem:[#allocation2 + $0x220] ss:$8 sps:$4 sm:$0xff]   ;;  %v1890_v63 = vld [vmem:[#allocation2 + $0x84] ss:$8 sps:$4 sm:$0xff]  }
  0x3b   :  { %872 = vmatpush1.bf16.msra.mxu1 %v1862_v39  ;;  %v1808_v0 = vld [vmem:[#allocation2 + $0x234] ss:$8 sps:$4 sm:$0xff]   ;;  %v1892_v1 = vld [vmem:[#allocation2 + $0x80] ss:$8 sps:$4 sm:$0xff]   ;;  %v1806_v2 = vld [vmem:[#allocation2 + $0x230] ss:$8 sps:$4 sm:$0xff]  }
  0x3c   :  { %919 = vmatpush1.bf16.msra.mxu0 %v1766_v11  ;;  %873 = vmatprep.subr.bf16.mxu1 %v1866_v41  ;;  %v1896_v3 = vld [vmem:[#allocation2 + $0x94] ss:$8 sps:$4 sm:$0xff]   ;;  %v1811_v4 = vld [vmem:[#allocation2 + $0x244] ss:$8 sps:$4 sm:$0xff]   ;;  %v1898_v5 = vld [vmem:[#allocation2 + $0x90] ss:$8 sps:$4 sm:$0xff]  }
  0x3d   :  { %920 = vmatprep.subr.bf16.mxu0 %v1767_v12  ;;  %v1809_v6 = vld [vmem:[#allocation2 + $0x240] ss:$8 sps:$4 sm:$0xff]   ;;  %v1902_v7 = vld [vmem:[#allocation2 + $0xa4] ss:$8 sps:$4 sm:$0xff]   ;;  %v1814_v8 = vld [vmem:[#allocation2 + $0x254] ss:$8 sps:$4 sm:$0xff]  }
  0x3e   :  { %v1904_v9 = vld [vmem:[#allocation2 + $0xa0] ss:$8 sps:$4 sm:$0xff]   ;;  %v1812_v10 = vld [vmem:[#allocation2 + $0x250] ss:$8 sps:$4 sm:$0xff]   ;;  %v1908_v11 = vld [vmem:[#allocation2 + $0xb4] ss:$8 sps:$4 sm:$0xff]  }
  0x3f   :  { %874 = vmatpush1.bf16.msra.mxu1 %v1868_v47  ;;  %v1817_v12 = vld [vmem:[#allocation2 + $0x264] ss:$8 sps:$4 sm:$0xff]   ;;  %v1910_v13 = vld [vmem:[#allocation2 + $0xb0] ss:$8 sps:$4 sm:$0xff]   ;;  %v1815_v15 = vld [vmem:[#allocation2 + $0x260] ss:$8 sps:$4 sm:$0xff]  }
  0x40   :  { %921 = vmatpush1.bf16.msra.mxu0 %v1769_v16  ;;  %875 = vmatprep.subr.bf16.mxu1 %v1872_v49  ;;  %v62_v14 = vld [vmem:[%s2271_s0 + $0x8] sm:$0xff]  ;;  %v1826_v27 = vld [vmem:[#allocation2 + $0x294] ss:$8 sps:$4 sm:$0xff]   ;;  %v1824_v28 = vld [vmem:[#allocation2 + $0x290] ss:$8 sps:$4 sm:$0xff]  }
  0x41   :  { %922 = vmatprep.subr.bf16.mxu0 %v1770_v17  ;;  %v1914_v16 = vld [vmem:[#allocation2 + $0xc4] ss:$8 sps:$4 sm:$0xff]   ;;  %v1928_v30 = vld [vmem:[#allocation2 + $0xe0] ss:$8 sps:$4 sm:$0xff]   ;;  %v1932_v31 = vld [vmem:[#allocation2 + $0xf4] ss:$8 sps:$4 sm:$0xff]  }
  0x42   :  { %v70_v17 = vld [vmem:[%s2271_s0 + $0x48] sm:$0xff]  ;;  %v1942_v38 = vld [vmem:[%s2274_s3] sm:$0xff]   ;;  %v1830_v39 = vld [vmem:[#allocation2 + $0x2b0] ss:$8 sps:$4 sm:$0xff]  }
  0x43   :  { %876 = vmatpush1.bf16.msra.mxu1 %v1874_v52  ;;  %v1827_v35 = vld [vmem:[#allocation2 + $0x2a0] ss:$8 sps:$4 sm:$0xff]   ;;  %v1838_v46 = vld [vmem:[#allocation2 + $0x2d4] ss:$8 sps:$4 sm:$0xff]   ;;  %v1836_v48 = vld [vmem:[#allocation2 + $0x2d0] ss:$8 sps:$4 sm:$0xff]  }
  0x44   :  { %923 = vmatpush1.bf16.msra.mxu0 %v1772_v18  ;;  %877 = vmatprep.subr.bf16.mxu1 %v1878_v56  ;;  %v1820_v18 = vld [vmem:[#allocation2 + $0x274] ss:$8 sps:$4 sm:$0xff]   ;;  %v1943_v41 = vld [vmem:[%s2274_s3 + $0x48] sm:$0xff]   ;;  %v73_v56 = vld [vmem:[%s2271_s0 + $0x60] sm:$0xff] }
  0x45   :  { %924 = vmatprep.subr.bf16.mxu0 %v1773_v19  ;;  %v78_v19 = vpack.c.bf16 %v70_v17, %v62_v14  ;;  %v1833_v44 = vld [vmem:[#allocation2 + $0x2c0] ss:$8 sps:$4 sm:$0xff]   ;;  %v1946_v47 = vld [vmem:[%s2274_s3 + $0x10] sm:$0xff]   ;;  %v1947_v49 = vld [vmem:[%s2274_s3 + $0x58] sm:$0xff]  }
  0x46   :  { %v1841_v50 = vld [vmem:[#allocation2 + $0x2e4] ss:$8 sps:$4 sm:$0xff]   ;;  %v1839_v52 = vld [vmem:[#allocation2 + $0x2e0] ss:$8 sps:$4 sm:$0xff]  }
  0x47   :  { %878 = vmatpush1.bf16.msra.mxu1 %v1880_v57  ;;  %897 = vmatprep.mubr.bf16.mxu1 %v78_v19  ;;  %v1853_v57 = vld [vmem:[#allocation2 + $0x304] ss:$8 sps:$4 sm:$0xff]   ;;  %v1899_v14 = vld [vmem:[#allocation2 + $0x380] ss:$8 sps:$4 sm:$0xff]   ;;  %v1919_v19 = vld [vmem:[#allocation2 + $0x3b4] ss:$8 sps:$4 sm:$0xff]  }
  0x48   :  { %925 = vmatpush1.bf16.msra.mxu0 %v1775_v20  ;;  %879 = vmatprep.subr.bf16.mxu1 %v1884_v59  ;;  %v1818_v20 = vld [vmem:[#allocation2 + $0x270] ss:$8 sps:$4 sm:$0xff]   ;;  %v1913_v17 = vld [vmem:[#allocation2 + $0x3a4] ss:$8 sps:$4 sm:$0xff]  }
  0x49   :  { %926 = vmatprep.subr.bf16.mxu0 %v1776_v21  ;;  %v1916_v21 = vld [vmem:[#allocation2 + $0xc0] ss:$8 sps:$4 sm:$0xff]   ;;  %v76_v59 = vld [vmem:[%s2271_s0 + $0x78] sm:$0xff] }
  0x4b   :  { %880 = vmatpush1.bf16.msra.mxu1 %v1886_v61  ;;  %v1851_v61 = vld [vmem:[#allocation2 + $0x300] ss:$8 sps:$4 sm:$0xff]  }
  0x4c   :  { %927 = vmatpush1.bf16.msra.mxu0 %v1778_v22  ;;  %881 = vmatprep.subr.bf16.mxu1 %v1890_v63  ;;  %v1920_v22 = vld [vmem:[#allocation2 + $0xd4] ss:$8 sps:$4 sm:$0xff]  }
  0x4d   :  { %928 = vmatprep.subr.bf16.mxu0 %v1779_v23  ;;  %v1823_v23 = vld [vmem:[#allocation2 + $0x284] ss:$8 sps:$4 sm:$0xff]   ;;  %v1859_v63 = vld [vmem:[#allocation2 + $0x314] ss:$8 sps:$4 sm:$0xff]  }
  0x4f   :  { %882 = vmatpush1.bf16.msra.mxu1 %v1892_v1  ;;  %v1865_v1 = vld [vmem:[#allocation2 + $0x324] ss:$8 sps:$4 sm:$0xff]  }
  0x50   :  { %929 = vmatpush1.bf16.msra.mxu0 %v1781_v24  ;;  %883 = vmatprep.subr.bf16.mxu1 %v1896_v3  ;;  %v1821_v24 = vld [vmem:[#allocation2 + $0x280] ss:$8 sps:$4 sm:$0xff]   ;;  %v1871_v3 = vld [vmem:[#allocation2 + $0x334] ss:$8 sps:$4 sm:$0xff]  }
  0x51   :  { %930 = vmatprep.subr.bf16.mxu0 %v1782_v25  ;;  %v1922_v25 = vld [vmem:[#allocation2 + $0xd0] ss:$8 sps:$4 sm:$0xff]  }
  0x53   :  { %884 = vmatpush1.bf16.msra.mxu1 %v1898_v5  ;;  %v1877_v5 = vld [vmem:[#allocation2 + $0x344] ss:$8 sps:$4 sm:$0xff]  }
  0x54   :  { %931 = vmatpush1.bf16.msra.mxu0 %v1784_v26  ;;  %885 = vmatprep.subr.bf16.mxu1 %v1902_v7  ;;  %v1926_v26 = vld [vmem:[#allocation2 + $0xe4] ss:$8 sps:$4 sm:$0xff]   ;;  %v1883_v7 = vld [vmem:[#allocation2 + $0x354] ss:$8 sps:$4 sm:$0xff]  }
  0x55   :  { %932 = vmatprep.subr.bf16.mxu0 %v1785_v29  ;;  %v1829_v29 = vld [vmem:[#allocation2 + $0x2a4] ss:$8 sps:$4 sm:$0xff]  }
  0x57   :  { %886 = vmatpush1.bf16.msra.mxu1 %v1904_v9  ;;  %v1889_v9 = vld [vmem:[#allocation2 + $0x364] ss:$8 sps:$4 sm:$0xff]  }
  0x58   :  { %933 = vmatpush1.bf16.msra.mxu0 %v1787_v32  ;;  %887 = vmatprep.subr.bf16.mxu1 %v1908_v11  ;;  %v1934_v32 = vld [vmem:[#allocation2 + $0xf0] ss:$8 sps:$4 sm:$0xff]   ;;  %v1895_v11 = vld [vmem:[#allocation2 + $0x374] ss:$8 sps:$4 sm:$0xff]  }
  0x59   :  { %934 = vmatprep.subr.bf16.mxu0 %v1788_v33  ;;  %v61_v33 = vld [vmem:[%s2271_s0] sm:$0xff] }
  0x5b   :  { %888 = vmatpush1.bf16.msra.mxu1 %v1910_v13  ;;  %v1901_v13 = vld [vmem:[#allocation2 + $0x384] ss:$8 sps:$4 sm:$0xff]  }
  0x5c   :  { %935 = vmatpush1.bf16.msra.mxu0 %v1790_v36  ;;  %889 = vmatprep.subr.bf16.mxu1 %v1914_v16  ;;  %v1941_v36 = vld [vmem:[%s2274_s3 + $0x40] sm:$0xff]   ;;  %v1905_v16 = vld [vmem:[#allocation2 + $0x390] ss:$8 sps:$4 sm:$0xff]  }
  0x5d   :  { %936 = vmatprep.subr.bf16.mxu0 %v1791_v37  ;;  %v1832_v37 = vld [vmem:[#allocation2 + $0x2b4] ss:$8 sps:$4 sm:$0xff]  }
  0x5f   :  { %890 = vmatpush1.bf16.msra.mxu1 %v1916_v21  ;;  %v1925_v21 = vld [vmem:[#allocation2 + $0x3c4] ss:$8 sps:$4 sm:$0xff]  }
  0x60   :  { %937 = vmatpush1.bf16.msra.mxu0 %v1793_v40  ;;  %891 = vmatprep.subr.bf16.mxu1 %v1920_v22  ;;  %v77_v40 = vpack.c.bf16 %v69_v34, %v61_v33  ;;  %v1923_v22 = vld [vmem:[#allocation2 + $0x3c0] ss:$8 sps:$4 sm:$0xff]  }
  0x61   :  { %938 = vmatprep.subr.bf16.mxu0 %v1794_v42  ;;  %v1835_v42 = vld [vmem:[#allocation2 + $0x2c4] ss:$8 sps:$4 sm:$0xff]  }
  0x62   :  { %v1950_v33 = vld [vmem:[%s2274_s3 + $0x20] sm:$0xff]   ;;  %v1951_v34 = vld [vmem:[%s2274_s3 + $0x68] sm:$0xff]  }
  0x63   :  { %892 = vmatpush1.bf16.msra.mxu1 %v1922_v25  ;;  %v1937_v25 = vld [vmem:[#allocation2 + $0x3e4] ss:$8 sps:$4 sm:$0xff]  }
  0x64   :  { %939 = vmatpush1.bf16.msra.mxu0 %v1796_v43  ;;  %893 = vmatprep.subr.bf16.mxu1 %v1926_v26  ;;  %v1944_v43 = vld [vmem:[%s2274_s3 + $0x8] sm:$0xff]  }
  0x65   :  { %951 = vmatprep.subr.bf16.mxu0 %v1799_v45  ;;  %v1945_v45 = vld [vmem:[%s2274_s3 + $0x50] sm:$0xff]   ;;  %v1935_v26 = vld [vmem:[#allocation2 + $0x3e0] ss:$8 sps:$4 sm:$0xff]  }
  0x67   :  { %941 = vmatmul.mubr.bf16.vlgmr.msra.gmra.mrb[0].mxu0 %v79_v51  ;;  %894 = vmatpush1.bf16.msra.mxu1 %v1928_v30  ;;  %v1948_v51 = vld [vmem:[%s2274_s3 + $0x18] sm:$0xff]   ;;  %v75_v30 = vld [vmem:[%s2271_s0 + $0x70] sm:$0xff] }
  0x68   :  { %952 = vmatpush1.bf16.msra.mxu0 %v1797_v53  ;;  %983 = vmatprep.mubr.bf16.mxu0 %v82_v55  ;;  %v1847_v53 = vld [vmem:[#allocation2 + $0x2f4] ss:$8 sps:$4 sm:$0xff]   ;;  %v65_v55 = vld [vmem:[%s2271_s0 + $0x20] sm:$0xff] }
  0x69   :  { %953 = vmatprep.subr.bf16.mxu0 %v1802_v54  ;;  %895 = vmatprep.subr.bf16.mxu1 %v1932_v31  ;;  %v1845_v54 = vld [vmem:[#allocation2 + $0x2f0] ss:$8 sps:$4 sm:$0xff]  }
  0x6b   :  { %896 = vmatpush1.bf16.msra.mxu1 %v1934_v32  ;;  %v1949_v32 = vld [vmem:[%s2274_s3 + $0x60] sm:$0xff]  }
  0x6c   :  { %954 = vmatpush1.bf16.msra.mxu0 %v1800_v58  ;;  %1645 = vmatprep.subr.bf16.mxu1 %v1941_v36  ;;  %v68_v58 = vld [vmem:[%s2271_s0 + $0x38] sm:$0xff]  ;;  %v1953_v36 = vld [vmem:[%s2274_s3 + $0x70] sm:$0xff]  }
  0x6d   :  { %955 = vmatprep.subr.bf16.mxu0 %v1805_v60  ;;  %v81_v60 = vpack.c.bf16 %v73_v56, %v65_v55 }
  0x6e   :  { %898 = vmatmul.mubr.bf16.vlgmr.msra.gmra.mrb[0].mxu1 %v77_v40  ;;  %v2035_v40 = vmov 0.0  }
  0x6f   :  { %1646 = vmatpush3.bf16.msra.mxu1 %v1942_v38  ;;  %v1955_v38 = vld [vmem:[%s2274_s3 + $0x78] sm:$0xff]  }
  0x70   :  { %956 = vmatpush1.bf16.msra.mxu0 %v1803_v62  ;;  %1647 = vmatprep.subr.bf16.mxu1 %v1943_v41  ;;  %v84_v62 = vpack.c.bf16 %v76_v59, %v68_v58 }
  0x71   :  { %957 = vmatprep.subr.bf16.mxu0 %v1808_v0  ;;  %v1857_v0 = vld [vmem:[#allocation2 + $0x310] ss:$8 sps:$4 sm:$0xff]  }
  0x73   :  { %1648 = vmatpush3.bf16.msra.mxu1 %v1944_v43 }
  0x74   :  { %958 = vmatpush1.bf16.msra.mxu0 %v1806_v2  ;;  %1649 = vmatprep.subr.bf16.mxu1 %v1945_v45  ;;  %v1863_v2 = vld [vmem:[#allocation2 + $0x320] ss:$8 sps:$4 sm:$0xff]   ;;  %v215_v45 = vlaneseq }
  0x75   :  { %959 = vmatprep.subr.bf16.mxu0 %v1811_v4  ;;  %v1869_v4 = vld [vmem:[#allocation2 + $0x330] ss:$8 sps:$4 sm:$0xff]  }
  0x77   :  { %1650 = vmatpush3.bf16.msra.mxu1 %v1946_v47 }
  0x78   :  { %960 = vmatpush1.bf16.msra.mxu0 %v1809_v6  ;;  %1651 = vmatprep.subr.bf16.mxu1 %v1947_v49  ;;  %v1875_v6 = vld [vmem:[#allocation2 + $0x340] ss:$8 sps:$4 sm:$0xff]  }
  0x79   :  { %961 = vmatprep.subr.bf16.mxu0 %v1814_v8  ;;  %v1881_v8 = vld [vmem:[#allocation2 + $0x350] ss:$8 sps:$4 sm:$0xff]  }
  0x7b   :  { %1652 = vmatpush3.bf16.msra.mxu1 %v1948_v51 }
  0x7c   :  { %962 = vmatpush1.bf16.msra.mxu0 %v1812_v10  ;;  %v1887_v10 = vld [vmem:[#allocation2 + $0x360] ss:$8 sps:$4 sm:$0xff]   ;;  %1653 = vmatprep.subr.bf16.mxu1 %v1949_v32  ;;  %v1971_v32 = vld [vmem:[#allocation4 + $0x30] sm:$0xff]  }
  0x7d   :  { %963 = vmatprep.subr.bf16.mxu0 %v1817_v12  ;;  %v1893_v12 = vld [vmem:[#allocation2 + $0x370] ss:$8 sps:$4 sm:$0xff]  }
  0x7f   :  { %1654 = vmatpush3.bf16.msra.mxu1 %v1950_v33  ;;  %v1972_v33 = vld [vmem:[#allocation4 + $0x38] sm:$0xff]  }
  0x80   :  { %964 = vmatpush1.bf16.msra.mxu0 %v1815_v15  ;;  %v1907_v15 = vld [vmem:[#allocation2 + $0x394] ss:$8 sps:$4 sm:$0xff]   ;;  %1655 = vmatprep.subr.bf16.mxu1 %v1951_v34  ;;  %v1627_v34 = vld [vmem:[%s2277_s6] ss:$0 sm:$0xff] }
  0x81   :  { %965 = vmatprep.subr.bf16.mxu0 %v1820_v18  ;;  %v1911_v18 = vld [vmem:[#allocation2 + $0x3a0] ss:$8 sps:$4 sm:$0xff]  }
  0x84   :  { %966 = vmatpush1.bf16.msra.mxu0 %v1818_v20  ;;  %v1917_v20 = vld [vmem:[#allocation2 + $0x3b0] ss:$8 sps:$4 sm:$0xff]  }
  0x85   :  { %967 = vmatprep.subr.bf16.mxu0 %v1823_v23  ;;  %v1931_v23 = vld [vmem:[#allocation2 + $0x3d4] ss:$8 sps:$4 sm:$0xff]  }
  0x88   :  { %968 = vmatpush1.bf16.msra.mxu0 %v1821_v24  ;;  %v1929_v24 = vld [vmem:[#allocation2 + $0x3d0] ss:$8 sps:$4 sm:$0xff]  }
  0x89   :  { %969 = vmatprep.subr.bf16.mxu0 %v1826_v27  ;;  %v1940_v27 = vld [vmem:[#allocation2 + $0x3f4] ss:$8 sps:$4 sm:$0xff]  }
  0x8c   :  { %970 = vmatpush1.bf16.msra.mxu0 %v1824_v28  ;;  %v1938_v28 = vld [vmem:[#allocation2 + $0x3f0] ss:$8 sps:$4 sm:$0xff]  }
  0x8d   :  { %971 = vmatprep.subr.bf16.mxu0 %v1829_v29  ;;  %v67_v29 = vld [vmem:[%s2271_s0 + $0x30] sm:$0xff] }
  0x8e   :  { %v83_v31 = vpack.c.bf16 %v75_v30, %v67_v29  ;;  %v1968_v29 = vld [vmem:[#allocation4 + $0x18] sm:$0xff]   ;;  %v1969_v30 = vld [vmem:[#allocation4 + $0x20] sm:$0xff]  }
  0x90   :  { %972 = vmatpush1.bf16.msra.mxu0 %v1827_v35  ;;  %v1952_v35 = vld [vmem:[%s2274_s3 + $0x28] sm:$0xff]  }
  0x91   :  { %973 = vmatprep.subr.bf16.mxu0 %v1832_v37  ;;  %1656 = vmatpush3.bf16.msra.mxu1 %v1952_v35  ;;  %v1954_v37 = vld [vmem:[%s2274_s3 + $0x30] sm:$0xff]  }
  0x92   :  { %1657 = vmatprep.subr.bf16.mxu1 %v1953_v36 }
  0x94   :  { %974 = vmatpush1.bf16.msra.mxu0 %v1830_v39  ;;  %v1956_v39 = vld [vmem:[%s2274_s3 + $0x38] sm:$0xff]  }
  0x95   :  { %975 = vmatprep.subr.bf16.mxu0 %v1835_v42  ;;  %1658 = vmatpush3.bf16.msra.mxu1 %v1954_v37 }
  0x96   :  { %1659 = vmatprep.subr.bf16.mxu1 %v1955_v38 }
  0x98   :  { %976 = vmatpush1.bf16.msra.mxu0 %v1833_v44 }
  0x99   :  { %977 = vmatprep.subr.bf16.mxu0 %v1838_v46  ;;  %1660 = vmatpush3.bf16.msra.mxu1 %v1956_v39  ;;  %v216_v46 = vshrl.u32 %v215_v45, 7 }
  0x9a   :  { %1685 = vmatprep.subr.bf16.mxu1 %v2035_v40 }
  0x9b   :  { %v217_v47 = vsub.s32 0, %v216_v46  ;;  %v221_v49 = vsub.s32 1, %v216_v46  ;;  %v1452_v46 = vand.u32 127, %v215_v45 }
  0x9c   :  { %978 = vmatpush1.bf16.msra.mxu0 %v1836_v48  ;;  %v213_v48 = vld [vmem:[%s2273_s2] sm:$0x3] }
  0x9d   :  { %979 = vmatprep.subr.bf16.mxu0 %v1841_v50  ;;  %v218_v50 = vrot.slane %v213_v48, %v217_v47  ;;  %v222_v51 = vrot.slane %v213_v48, %v221_v49  ;;  %vm1453_vm1 = vcmp.lt.s32.totalorder %v1452_v46, 10 }
  0xa0   :  { %980 = vmatpush1.bf16.msra.mxu0 %v1839_v52 }
  0xa1   :  { %981 = vmatprep.subr.bf16.mxu0 %v1847_v53 }
  0xa4   :  { %982 = vmatpush1.bf16.msra.mxu0 %v1845_v54 }
  0xa5   :  { %994 = vmatprep.subr.bf16.mxu0 %v1853_v57 }
  0xa7   :  { %984 = vmatmul.mubr.bf16.vlgmr.msra.gmra.mrb[0].mxu0 %v81_v60 }
  0xa8   :  { %995 = vmatpush1.bf16.msra.mxu0 %v1851_v61  ;;  %1026 = vmatprep.mubr.bf16.mxu0 %v84_v62 }
  0xa9   :  { %996 = vmatprep.subr.bf16.mxu0 %v1859_v63 }
  0xac   :  { %997 = vmatpush1.bf16.msra.mxu0 %v1857_v0 }
  0xad   :  { %998 = vmatprep.subr.bf16.mxu0 %v1865_v1 }
  0xb0   :  { %999 = vmatpush1.bf16.msra.mxu0 %v1863_v2 }
  0xb1   :  { %1000 = vmatprep.subr.bf16.mxu0 %v1871_v3 }
  0xb4   :  { %1001 = vmatpush1.bf16.msra.mxu0 %v1869_v4 }
  0xb5   :  { %1002 = vmatprep.subr.bf16.mxu0 %v1877_v5 }
  0xb8   :  { %1003 = vmatpush1.bf16.msra.mxu0 %v1875_v6  ;;  %v1957_v6 = vld [vmem:[%s2276_s5] sm:$0xff]  }
  0xb9   :  { %1004 = vmatprep.subr.bf16.mxu0 %v1883_v7  ;;  %v1958_v7 = vld [vmem:[%s2276_s5 + $0x8] sm:$0xff]  }
  0xbc   :  { %1005 = vmatpush1.bf16.msra.mxu0 %v1881_v8  ;;  %v1959_v8 = vld [vmem:[%s2276_s5 + $0x10] sm:$0xff]  }
  0xbd   :  { %1006 = vmatprep.subr.bf16.mxu0 %v1889_v9  ;;  %v1960_v9 = vld [vmem:[%s2276_s5 + $0x18] sm:$0xff]  }
  0xc0   :  { %1007 = vmatpush1.bf16.msra.mxu0 %v1887_v10  ;;  %v1961_v10 = vld [vmem:[%s2276_s5 + $0x20] sm:$0xff]  }
  0xc1   :  { %1008 = vmatprep.subr.bf16.mxu0 %v1895_v11  ;;  %v1962_v11 = vld [vmem:[%s2276_s5 + $0x28] sm:$0xff]  }
  0xc4   :  { %1009 = vmatpush1.bf16.msra.mxu0 %v1893_v12  ;;  %v1963_v12 = vld [vmem:[%s2276_s5 + $0x30] sm:$0xff]  }
  0xc5   :  { %1010 = vmatprep.subr.bf16.mxu0 %v1901_v13  ;;  %v1964_v13 = vld [vmem:[%s2276_s5 + $0x38] sm:$0xff]  }
  0xc8   :  { %1011 = vmatpush1.bf16.msra.mxu0 %v1899_v14 }
  0xc9   :  { %1012 = vmatprep.subr.bf16.mxu0 %v1907_v15  ;;  %v1610_v15 = vld [vmem:[%s2275_s4] ss:$0 sm:$0xff] }
  0xcc   :  { %1013 = vmatpush1.bf16.msra.mxu0 %v1905_v16 }
  0xcd   :  { %1014 = vmatprep.subr.bf16.mxu0 %v1913_v17 }
  0xd0   :  { %1015 = vmatpush1.bf16.msra.mxu0 %v1911_v18 }
  0xd1   :  { %1016 = vmatprep.subr.bf16.mxu0 %v1919_v19 }
  0xd4   :  { %1017 = vmatpush1.bf16.msra.mxu0 %v1917_v20 }
  0xd5   :  { %1018 = vmatprep.subr.bf16.mxu0 %v1925_v21 }
  0xd8   :  { %1019 = vmatpush1.bf16.msra.mxu0 %v1923_v22 }
  0xd9   :  { %1020 = vmatprep.subr.bf16.mxu0 %v1931_v23 }
  0xdc   :  { %1021 = vmatpush1.bf16.msra.mxu0 %v1929_v24 }
  0xdd   :  { %1022 = vmatprep.subr.bf16.mxu0 %v1937_v25  ;;  %v1965_v25 = vld [vmem:[#allocation4] sm:$0xff]  }
  0xe0   :  { %1023 = vmatpush1.bf16.msra.mxu0 %v1935_v26 }
  0xe1   :  { %1024 = vmatprep.subr.bf16.mxu0 %v1940_v27  ;;  %v1966_v27 = vld [vmem:[#allocation4 + $0x8] sm:$0xff]  }
  0xe4   :  { %1025 = vmatpush1.bf16.msra.mxu0 %v1938_v28  ;;  %v1967_v28 = vld [vmem:[#allocation4 + $0x10] sm:$0xff]  }
  0xe7   :  { %1027 = vmatmul.mubr.bf16.vlgmr.msra.gmra.mrb[0].mxu0 %v83_v31  ;;  %v1970_v31 = vld [vmem:[#allocation4 + $0x28] sm:$0xff]  }
 0x141   :  { %v899_v41 = vpop.f32.mrb[0].mxu1 }
 0x142   :  { %v901_v42 = vpop.f32.mrb[1].mxu1  ;;  %v900_v52 = vadd.f32 %v899_v41, %v218_v50 }
 0x143   :  { %v903_v43 = vpop.f32.mrb[2].mxu1  ;;  %v902_v53 = vadd.f32 %v901_v42, %v222_v51 }
 0x144   :  { %v905_v44 = vpop.f32.mrb[3].mxu1  ;;  %v904_v55 = vadd.f32 %v903_v43, %v218_v50 }
 0x145   :  { %v906_v58 = vadd.f32 %v905_v44, %v222_v51 }
 0x1ba   :  { %v1028_v54 = vpop.f32.mrb[0].mxu0 }
 0x1bb   :  { %v1726_v56 = vadd.f32 %v1028_v54, %v900_v52  ;;  %v1030_v57 = vpop.f32.mrb[1].mxu0 }
 0x1bc   :  { %v1728_v59 = vadd.f32 %v1030_v57, %v902_v53  ;;  %v1032_v60 = vpop.f32.mrb[2].mxu0 }
 0x1bd   :  { %v1730_v61 = vadd.f32 %v1032_v60, %v904_v55  ;;  %v1034_v62 = vpop.f32.mrb[3].mxu0  ;;  %v1037_v0 = vmax.f32 %v1726_v56, 0.0 }
 0x1be   :  { %v1732_v63 = vadd.f32 %v1034_v62, %v906_v58  ;;  %v1038_v2 = vmax.f32 %v1728_v59, 0.0 }
 0x1bf   :  { %v1039_v1 = vmax.f32 %v1730_v61, 0.0 }
 0x1c0   :  { %v1040_v3 = vmax.f32 %v1732_v63, 0.0 }
 0x1c1   :  { %v1041_v4 = vpack.c.bf16 %v1039_v1, %v1037_v0 }
 0x1c2   :  { %v1042_v5 = vpack.c.bf16 %v1040_v3, %v1038_v2 }
 0x1c4   :  { %1210 = vmatprep.mubr.bf16.mxu1 %v1042_v5 }
 0x1c5   :  { %1211 = vmatmul.mubr.bf16.vlgmr.msra.gmra.mrb[4].mxu1 %v1041_v4 }
 0x1c6   :  { %1686 = vmatpush3.bf16.msra.mxu1 %v1957_v6  ;;  %1701 = vmatprep.mubr.msk.bf16.mxu1 %vm2036_vm0, %v2035_v40 }
 0x1c7   :  { %1687 = vmatprep.subr.bf16.mxu1 %v2035_v40 }
 0x1ca   :  { %1688 = vmatpush3.bf16.msra.mxu1 %v1958_v7 }
 0x1cb   :  { %1689 = vmatprep.subr.bf16.mxu1 %v2035_v40 }
 0x1ce   :  { %1690 = vmatpush3.bf16.msra.mxu1 %v1959_v8 }
 0x1cf   :  { %1691 = vmatprep.subr.bf16.mxu1 %v2035_v40 }
 0x1d2   :  { %1692 = vmatpush3.bf16.msra.mxu1 %v1960_v9 }
 0x1d3   :  { %1693 = vmatprep.subr.bf16.mxu1 %v2035_v40 }
 0x1d6   :  { %1694 = vmatpush3.bf16.msra.mxu1 %v1961_v10 }
 0x1d7   :  { %1695 = vmatprep.subr.bf16.mxu1 %v2035_v40 }
 0x1da   :  { %1696 = vmatpush3.bf16.msra.mxu1 %v1962_v11 }
 0x1db   :  { %1697 = vmatprep.subr.bf16.mxu1 %v2035_v40 }
 0x1de   :  { %1698 = vmatpush3.bf16.msra.mxu1 %v1963_v12 }
 0x1df   :  { %1699 = vmatprep.subr.bf16.mxu1 %v2035_v40 }
 0x1e2   :  { %1700 = vmatpush3.bf16.msra.mxu1 %v1964_v13 }
 0x1e3   :  { %1705 = vmatprep.subr.bf16.mxu1 %v2035_v40 }
 0x298   :  { %v1661_v14 = vpop.f32.mrb[4].mxu1 }
 0x299   :  { %v1662_v16 = vpop.f32.mrb[5].mxu1 }
 0x29a   :  { %v1663_v17 = vadd.f32 %v1662_v16, %v1661_v14  ;;  %v1664_v18 = vpop.f32.mrb[6].mxu1 }
 0x29b   :  { %v1665_v19 = vpop.f32.mrb[7].mxu1 }
 0x29c   :  { %v1213_v20 = vadd.f32 %v1663_v17, %v1610_v15  ;;  %v1666_v21 = vadd.f32 %v1665_v19, %v1664_v18 }
 0x29e   :  { %v1216_v22 = vadd.f32 %v1666_v21, %v1610_v15  ;;  %v1219_v23 = vmax.f32 %v1213_v20, 0.0 }
 0x2a0   :  { %v1220_v24 = vmax.f32 %v1216_v22, 0.0 }
 0x2a2   :  { %v1221_v26 = vpack.c.bf16 %v1220_v24, %v1219_v23 }
 0x2a4   :  { %1702 = vmatmul.mubr.bf16.vlgmr.msra.gmra.mrb[8].mxu1 %v1221_v26 }
 0x2a5   :  { %1706 = vmatpush3.bf16.msra.mxu1 %v1965_v25  ;;  %1721 = vmatprep.mubr.msk.bf16.mxu1 %vm2036_vm0, %v2035_v40 }
 0x2a6   :  { %1707 = vmatprep.subr.bf16.mxu1 %v2035_v40 }
 0x2a9   :  { %1708 = vmatpush3.bf16.msra.mxu1 %v1966_v27 }
 0x2aa   :  { %1709 = vmatprep.subr.bf16.mxu1 %v2035_v40 }
 0x2ad   :  { %1710 = vmatpush3.bf16.msra.mxu1 %v1967_v28 }
 0x2ae   :  { %1711 = vmatprep.subr.bf16.mxu1 %v2035_v40 }
 0x2b1   :  { %1712 = vmatpush3.bf16.msra.mxu1 %v1968_v29 }
 0x2b2   :  { %1713 = vmatprep.subr.bf16.mxu1 %v2035_v40 }
 0x2b5   :  { %1714 = vmatpush3.bf16.msra.mxu1 %v1969_v30 }
 0x2b6   :  { %1715 = vmatprep.subr.bf16.mxu1 %v2035_v40 }
 0x2b9   :  { %1716 = vmatpush3.bf16.msra.mxu1 %v1970_v31 }
 0x2ba   :  { %1717 = vmatprep.subr.bf16.mxu1 %v2035_v40 }
 0x2bd   :  { %1718 = vmatpush3.bf16.msra.mxu1 %v1971_v32 }
 0x2be   :  { %1719 = vmatprep.subr.bf16.mxu1 %v2035_v40  ;;  %v1636_v40 = vld [vmem:[%s2279_s8] ss:$0 sm:$0xff] }
 0x2c1   :  { %1720 = vmatpush3.bf16.msra.mxu1 %v1972_v33 }
 0x377   :  { %v1327_v35 = vpop.f32.mrb[8].mxu1 }
 0x378   :  { %v1328_v36 = vadd.f32 %v1627_v34, %v1327_v35  ;;  %v1703_v37 = vpop.f32.mrb[9].mxu1 }
 0x379   :  { %v1330_v38 = vpop.f32.mrb[10].mxu1 }
 0x37a   :  { %v1331_v39 = vadd.f32 %v1627_v34, %v1330_v38  ;;  %v1704_v41 = vpop.f32.mrb[11].mxu1  ;;  %v1334_v42 = vmax.f32 %v1328_v36, 0.0 }
 0x37c   :  { %v1335_v43 = vmax.f32 %v1331_v39, 0.0 }
 0x37e   :  { %v1336_v44 = vpack.c.bf16 %v1335_v43, %v1334_v42 }
 0x380   :  { %1722 = vmatmul.mubr.bf16.vlgmr.msra.gmra.mrb[12].mxu1 %v1336_v44 }
 0x453   :  { %v1442_v47 = vpop.f32.mrb[12].mxu1 }
 0x454   :  { %v1443_v48 = vadd.f32 %v1636_v40, %v1442_v47  ;;  %v1723_v49 = vpop.f32.mrb[13].mxu1 }
 0x455   :  { %v1445_v50 = vpop.f32.mrb[14].mxu1 }
 0x456   :  { %v1449_v51 = vmax.f32 %v1443_v48, 0.0  ;;  %v1446_v52 = vadd.f32 %v1636_v40, %v1445_v50  ;;  %v1724_v53 = vpop.f32.mrb[15].mxu1 }
 0x458   :  { %v1450_v54 = vmax.f32 %v1446_v52, 0.0  ;;  %v1454_v55 = vsel %vm1453_vm1, %v1449_v51, -1e+30 }
 0x459   :  { %1456 = vmax.xlane.f32.xlu0 %v1454_v55 }
 0x45a   :  { %v1455_v56 = vsel %vm1453_vm1, %v1450_v54, -1e+30 }
 0x45d   :  { %1458 = vmax.xlane.f32.xlu0 %v1455_v56 }
 0x4e6   :  { %v1457_v57 = vpop.xlane.xlu0 %1456 }
 0x4e7   :  { %v1460_v58 = vsub.f32 %v1454_v55, %v1457_v57 }
 0x4e9   :  { %v1462_v59 = vmul.f32 1.442695, %v1460_v58 }
 0x4ea   :  { %v1459_v60 = vpop.xlane.xlu0 %1458 }
 0x4eb   :  { %1973 = vpow2.f32 %v1462_v59  ;;  %v1461_v61 = vsub.f32 %v1455_v56, %v1459_v60 }
 0x4ed   :  { %v1464_v45 = vmul.f32 1.442695, %v1461_v61 }
 0x4ef   :  { %1975 = vpow2.f32 %v1464_v45 }
 0x4f5   :  { %v1974_v62 = vpop.eup %1973 }
 0x4f6   :  { %1466 = vadd.xlane.f32.xlu1 %v1974_v62 }
 0x4f9   :  { %v1976_v63 = vpop.eup %1975 }
 0x4fa   :  { %1468 = vadd.xlane.f32.xlu1 %v1976_v63 }
 0x583   :  { %v1467_v0 = vpop.xlane.xlu1 %1466 }
 0x584   :  { %1977 = vrcp.f32 %v1467_v0 }
 0x587   :  { %v1469_v1 = vpop.xlane.xlu1 %1468 }
 0x588   :  { %1979 = vrcp.f32 %v1469_v1 }
 0x58e   :  { %v1978_v2 = vpop.eup %1977 }
 0x58f   :  { %v1471_v3 = vmul.f32 %v1978_v2, %v1974_v62 }
 0x591   :  { %1474 = vst [vmem:[%s2280_s9] sm:$0xff] %v1471_v3 }
 0x592   :  { %v1980_v4 = vpop.eup %1979 }
 0x593   :  { %v1473_v5 = vmul.f32 %v1980_v4, %v1976_v63 }
 0x595   :  { %1475 = vst [vmem:[%s2280_s9 + $0x8] sm:$0xff] %v1473_v5 }
 0x596   :  { %1480 = vsyncpa [#allocation3], 1 }
 0x597   :  { %1481 = vsyncpa [#allocation5], 1 }

</bundles_post_ra>
